<compile_context>
chip_gen: v7x
topology: tpu7x:2x2x1
jax: 0.10.0
libtpu: 0.0.40
codegen_flags: <defaults>
</compile_context>

<pallas_src>
import math
import functools

import jax
import jax.numpy as jnp
from jax import lax
from jax.experimental import pallas as pl
from jax.experimental.pallas import tpu as pltpu


_TARGET_BLOCK_BYTES = 1 << 20  # ~1 MiB per tile; 3 arrays x 2 buffers ~ 6 MiB VMEM.


def _pe_dropout_kernel(seed_ref, x_ref, pe_ref, o_ref, *,
                       p, deterministic, rows_per_block, lanes):
    """One (1, rows_per_block, lanes) tile: y = x + pe, then inverted dropout."""
    y = x_ref[...] + pe_ref[...]

    if deterministic or p == 0.0:
        o_ref[...] = y.astype(o_ref.dtype)
        return
    if p >= 1.0:
        o_ref[...] = jnp.zeros_like(y).astype(o_ref.dtype)
        return

    # Unique per-element counter across the whole (B, R, C) tensor
    # (includes both grid axes, so no mask repetition across tiles or batches).
    blk = pl.program_id(1) * pl.num_programs(0) + pl.program_id(0)
    blk_u = blk.astype(jnp.uint32)
    rows = lax.broadcasted_iota(jnp.int32, y.shape, 1).astype(jnp.uint32)
    cols = lax.broadcasted_iota(jnp.int32, y.shape, 2).astype(jnp.uint32)
    idx = (blk_u * jnp.uint32(rows_per_block * lanes)
           + rows * jnp.uint32(lanes) + cols)

    # murmur3-style finalizer mixed with the user seed -> uniform uint32 bits.
    # TODO(synk): PyTorch's exact dropout RNG stream cannot be reproduced; this
    # implements the same distribution (zero w.p. p, scale survivors by 1/(1-p)).
    seed = seed_ref[0].astype(jnp.uint32)
    h = idx ^ (seed * jnp.uint32(0x9E3779B9) + jnp.uint32(0x7F4A7C15))
    h = (h ^ (h >> 16)) * jnp.uint32(0x85EBCA6B)
    h = (h ^ (h >> 13)) * jnp.uint32(0xC2B2AE35)
    h = h ^ (h >> 16)

    # Integer threshold compare (keep w.p. 1 - p) + fused select-and-scale.
    threshold = jnp.uint32(min(int(round(p * float(1 << 32))), (1 << 32) - 1))
    scale = 1.0 / (1.0 - p)
    o_ref[...] = jnp.where(h >= threshold, y * scale, 0.0).astype(o_ref.dtype)


def make_positional_encoding(d_model: int, max_len: int = 5000, dtype=jnp.float32):
    """Same `pe` buffer as the PyTorch module: shape (1, max_len, d_model)."""
    position = jnp.arange(max_len, dtype=jnp.float32)[:, None]
    div_term = jnp.exp(
        jnp.arange(0, d_model, 2, dtype=jnp.float32) * (-math.log(10000.0) / d_model)
    )
    pe = jnp.zeros((max_len, d_model), dtype=jnp.float32)
    pe = pe.at[:, 0::2].set(jnp.sin(position * div_term))
    pe = pe.at[:, 1::2].set(jnp.cos(position * div_term))
    return pe[None, :, :].astype(dtype)


def _largest_lane_multiple(n: int, cap: int = 8192) -> int:
    """Largest multiple of 128 that divides `n` (capped); 0 if none exists."""
    best = 0
    c = 128
    while c <= min(n, cap):
        if n % c == 0:
            best = c
        c += 128
    return best


def _choose_row_tile(n_rows: int, lanes: int, itemsize: int) -> int:
    """Multiple-of-8 row tile with block bytes <= ~_TARGET_BLOCK_BYTES (n_rows >= 8)."""
    max_rows = max(8, ((_TARGET_BLOCK_BYTES // (lanes * itemsize)) // 8) * 8)
    limit = (min(n_rows, max_rows) // 8) * 8
    best = 0
    d = 8
    while d <= limit:  # prefer an even divisor -> no masked boundary block
        if n_rows % d == 0:
            best = d
        d += 8
    return best if best else limit


def positional_encoding_forward(x, pe, seed, *, p: float = 0.2, deterministic: bool = False):
    """x: (B, S, D).  pe: (1, max_len, D).  seed: int32 array of shape (1,)."""
    B, S, D = x.shape
    max_len = pe.shape[1]
    assert S <= max_len, "seq_len exceeds positional-encoding max_len"
    N = S * D
    pe = pe.astype(x.dtype)

    # Lane-dense flattened layout: last dim a multiple of 128 when possible.
    lanes = _largest_lane_multiple(math.gcd(N, max_len * D))
    if lanes:
        # Common factorization: reshape the FULL pe buffer (no slice / extra copy).
        xr = x.reshape(B, N // lanes, lanes)
        per = pe.reshape(1, (max_len * D) // lanes, lanes)
    else:
        lanes = _largest_lane_multiple(N)
        if lanes:
            xr = x.reshape(B, N // lanes, lanes)
            per = pe[:, :S, :].reshape(1, N // lanes, lanes)  # static prefix slice
        else:
            # No 128-aligned factorization; natural layout, full-D (full-dim) blocks.
            xr, per, lanes = x, pe, D

    R = xr.shape[1]
    if R < 8:
        tR = R
        per = per[:, :R, :]  # tiny problem: make pe rows == x rows (full-dim block)
    else:
        tR = _choose_row_tile(R, lanes, x.dtype.itemsize)
    num_r = pl.cdiv(R, tR)

    kernel = functools.partial(
        _pe_dropout_kernel, p=p, deterministic=deterministic,
        rows_per_block=tR, lanes=lanes)

    grid_spec = pltpu.PrefetchScalarGridSpec(
        num_scalar_prefetch=1,                 # seed lands in SMEM
        # Row-tiles outer, batch inner: pe's block index is constant across the
        # inner batch sweep, so its tile is not re-DMA'd per batch element.
        grid=(num_r, B),
        in_specs=[
            pl.BlockSpec((1, tR, lanes), lambda r, b, seed: (b, r, 0)),   # x
            pl.BlockSpec((1, tR, lanes), lambda r, b, seed: (0, r, 0)),   # pe
        ],
        out_specs=pl.BlockSpec((1, tR, lanes), lambda r, b, seed: (b, r, 0)),
    )

    out = pl.pallas_call(
        kernel,
        out_shape=jax.ShapeDtypeStruct(xr.shape, x.dtype),
        grid_spec=grid_spec,
        compiler_params=pltpu.CompilerParams(
            dimension_semantics=("parallel", "parallel"),
        ),
    )(seed, xr, per)
    return out.reshape(B, S, D)


if __name__ == "__main__":
    B, S, D = 2, 8, 32
    MAX_LEN = 64
    P_DROP = 0.2

    key = jax.random.PRNGKey(0)
    x = jax.random.normal(key, (B, S, D), dtype=jnp.float32)
    pe = make_positional_encoding(D, max_len=MAX_LEN)
    seed = jnp.array([123], dtype=jnp.int32)

    ref = x + pe[:, :S, :]

    # Eval-mode path (dropout = identity): must match x + pe exactly.
    y_eval = positional_encoding_forward(x, pe, seed, p=P_DROP, deterministic=True)
    y_eval = jax.block_until_ready(y_eval)
    assert y_eval.shape == (B, S, D)
    assert jnp.allclose(y_eval, ref, atol=1e-6), "eval-mode mismatch"

    # Training-mode path: every output element is either 0 or (x+pe)/(1-p).
    y_train = positional_encoding_forward(x, pe, seed, p=P_DROP, deterministic=False)
    y_train = jax.block_until_ready(y_train)
    assert y_train.shape == (B, S, D)
    scaled = ref / (1.0 - P_DROP)
    ok = jnp.where(y_train == 0.0, True, jnp.abs(y_train - scaled) < 1e-5)
    assert bool(jnp.all(ok)), "train-mode values are not in {0, (x+pe)/(1-p)}"
    n_drop = int(jnp.sum(y_train == 0.0))
    assert 0 < n_drop < y_train.size, "dropout mask looks degenerate"

    print("KERNEL_OK")
</pallas_src>

<mosaic_0001>
module attributes {stable_mosaic.version = 11 : i64} {
  func.func @_pe_dropout_kernel(%arg0: i32, %arg1: i32, %arg2: memref<1xi32, #tpu.memory_space<smem>>, %arg3: memref<1x1x256xf32, #tpu.memory_space<vmem>>, %arg4: memref<1x1x256xf32, #tpu.memory_space<vmem>>, %arg5: memref<1x1x256xf32, #tpu.memory_space<vmem>>) attributes {dimension_semantics = [#tpu.dimension_semantics<parallel>, #tpu.dimension_semantics<parallel>], iteration_bounds = array<i64: 1, 2>, scalar_prefetch = 1 : i64, scratch_operands = 0 : i64, tpu.core_type = #tpu.core_type<tc>, window_params = [{transform_indices = @transform_0, window_bounds = array<i64: 1, 1, 256>}, {transform_indices = @transform_1, window_bounds = array<i64: 1, 1, 256>}, {transform_indices = @transform_2, window_bounds = array<i64: 1, 1, 256>}]} {
    %c0 = arith.constant 0 : index
    %c0_0 = arith.constant 0 : index
    %c0_1 = arith.constant 0 : index
    %0 = vector.load %arg3[%c0, %c0_0, %c0_1] : memref<1x1x256xf32, #tpu.memory_space<vmem>>, vector<1x1x256xf32>
    %c0_2 = arith.constant 0 : index
    %c0_3 = arith.constant 0 : index
    %c0_4 = arith.constant 0 : index
    %1 = vector.load %arg4[%c0_2, %c0_3, %c0_4] : memref<1x1x256xf32, #tpu.memory_space<vmem>>, vector<1x1x256xf32>
    %2 = arith.addf %0, %1 : vector<1x1x256xf32>
    %c0_5 = arith.constant 0 : index
    %c0_6 = arith.constant 0 : index
    %c0_7 = arith.constant 0 : index
    %3 = vector.load %arg5[%c0_5, %c0_6, %c0_7] : memref<1x1x256xf32, #tpu.memory_space<vmem>>, vector<1x1x256xf32>
    tpu.vector_store %arg5[%c0_5, %c0_6, %c0_7], %2 {strides = array<i32>} : memref<1x1x256xf32, #tpu.memory_space<vmem>>, vector<1x1x256xf32>,
    return
  }
  func.func @transform_0(%arg0: i32, %arg1: i32, %arg2: memref<1xi32, #tpu.memory_space<smem>>) -> (i32, i32, i32) {
    %c0_i32 = arith.constant 0 : i32
    %c0_i32_0 = arith.constant 0 : i32
    return %arg1, %arg0, %c0_i32 : i32, i32, i32
  }
  func.func @transform_1(%arg0: i32, %arg1: i32, %arg2: memref<1xi32, #tpu.memory_space<smem>>) -> (i32, i32, i32) {
    %c0_i32 = arith.constant 0 : i32
    %c0_i32_0 = arith.constant 0 : i32
    %c0_i32_1 = arith.constant 0 : i32
    return %c0_i32, %arg0, %c0_i32_0 : i32, i32, i32
  }
  func.func @transform_2(%arg0: i32, %arg1: i32, %arg2: memref<1xi32, #tpu.memory_space<smem>>) -> (i32, i32, i32) {
    %c0_i32 = arith.constant 0 : i32
    %c0_i32_0 = arith.constant 0 : i32
    return %arg1, %arg0, %c0_i32 : i32, i32, i32
  }
}

</mosaic_0001>

<bundles_post_ra>
// kernel: tpu_custom_call.1
= control target key start
LH: loop header
LB: loop body
LE: loop exit
PB: predicated region body
PF: predicated region fallthrough
CT: control target
= control target key end

     0   :  { %9 = vsyncpa [#allocation5], 0  ;;  %s712_s0 = inlined_call_operand.<no memory space> [shape: s32[1], index: 0, kind: input, shape index: {}]   ;;  %s713_s1 = inlined_call_operand.hbm [shape: f32[2,1,256], index: 1, kind: input, shape index: {}]   ;;  %s714_s2 = inlined_call_operand.vmem [shape: f32[1,1,256], index: 2, kind: input, shape index: {}]   ;;  %s715_s3 = inlined_call_operand.hbm [shape: f32[2,1,256], index: 3, kind: output, shape index: {}]  }
   0x1   :  { %11 = vsyncpa [#allocation5 + $0x1], 0 }
   0x2   :  { %12 = vsyncpa [#allocation6], 0 }
   0x3   :  { %14 = vsyncpa [#allocation6 + $0x1], 0  ;;  %s537_s12 = smov 0   ;;  %s539_s13 = smov 0  }
   0x4   :  { %s541_s14 = smov 0   ;;  %s543_s0 = smov 0  }
   0x5   :  { %s545_s15 = smov 0   ;;  %s547_s16 = smov 0  }
   0x6 LB: > { %s321_s17 = sadd.s32 4294967295, %s513_s16   ;;  %s322_s18 = sadd.s32 4294967294, %s513_s16   ;;  %s513_s16 = sphi %s547_s16, %s20_s16   ;;  %s509_s15 = sphi %s545_s15, %s731_s15   ;;  %s505_s0 = sphi %s543_s0, %s730_s0   ;;  %s501_s14 = sphi %s541_s14, %s729_s14   ;;  %s497_s13 = sphi %s539_s13, %s728_s13   ;;  %s493_s12 = sphi %s537_s12, %s727_s12  }
   0x7   : > { %s29_s19 = sadd.s32 1, %s509_s15  ;;  %s41_s20 = sadd.s32 1, %s501_s14 }
   0x8   : > { %p30_p0 = scmp.ge.s32.totalorder %s29_s19, 2  ;;  %p48_p1 = scmp.ne.s32.totalorder %s501_s14, %s497_s13 }
   0x9   : > { %p49_p2 = scmp.eq.s32.totalorder %s513_s16, 0  ;;  %p54_p3 = scmp.ne.s32.totalorder %s497_s13, %s493_s12 }
   0xa   : > { %s733_s19 = smov (%p30_p0, %s29_s19), 0  ;;  %p55_p5 = scmp.eq.s32.totalorder %s321_s17, 0 }
   0xb   : > { %p578_p4 = por %p49_p2, %p48_p1  ;;  %s36_s22 = ssub.s32 %s509_s15, %s733_s19 }
   0xc   : > { %p106_p6 = scmp.eq.s32.totalorder %s321_s17, 1  ;;  %p39_p7 = scmp.eq.s32.totalorder %s36_s22, 0 }
   0xd   : > { %p584_p8 = por %p55_p5, %p54_p3  ;;  %p112_p10 = scmp.eq.s32.totalorder %s322_s18, 1 }
   0xe   : > { %p588_p9 = por %p106_p6, %p48_p1  ;;  %p351_p13 = scmp.lt.s32.totalorder %s513_s16, 2 }
   0xf   : > { %s593_s25 = scalar_select %p39_p7, %s501_s14, %s41_s20  }
  0x10   : > { %s719_s24 = scalar_select %p588_p9, 1, 0 }
  0x11   : > { %p595_p11 = por %p112_p10, %p54_p3  ;;  %s139_s27 = sand.u32 1, %s501_s14  }
  0x12   : > { %s326_s28 = sshll.u32 %s139_s27, 1  ;;  %s337_s29 = sshll.u32 %s509_s15, 5 }
  0x13   : > { %s720_s26 = scalar_select %p595_p11, 1, 0 }
  0x14   : > { %s606_s5 = scalar_lea.hbm %s713_s1, %s337_s29  ;;  %s143_s6 = scalar_lea.vmem [#allocation4], %s326_s28 }
  0x15   : > { %s153_s7 = sshll.u32 %s143_s6, 4  ;;  %p612_p0 = pnand %p351_p13, %p578_p4  ;;  %s608_s7 = int_to_ptr.vmem [resolvable:$true] %s153_s7 }
  0x16   : > { %s140_s9 = scalar_lea.sflag [#allocation5], %s139_s27  ;;  %s401_s10 = scalar_lea.hbm %s606_s5, 32 }
  0x17   : > { %p402_p3 = scmp.ne.s32.totalorder %s606_s5, %s401_s10  ;;  %p403_p5 = pneg %p612_p0 }
  0x18   : > { %s406_s18 = scalar_lea.hbm %s713_s1, 64  ;;  %p407_p4 = scmp.lt.u32.totalorder %s606_s5, %s713_s1 }
  0x19   : > { %p404_p6 = pnand %p403_p5, %p402_p3  ;;  %p408_p10 = scmp.lt.u32.totalorder %s406_s18, %s401_s10 }
  0x1a   : > { %p410_p12 = scmp.lt.u32.totalorder %s401_s10, %s606_s5 }
  0x1b   : > { %p405_p7 = pneg %p404_p6  ;;  %p409_p13 = por %p408_p10, %p407_p4 }
  0x1d   : > { %p411_p1 = por %p410_p12, %p409_p13 }
  0x1f   : > { %p412_p2 = pnand %p411_p1, %p405_p7 }
  0x21   : > { %415 = shalt.err (!%p412_p2)
}
  0x22   : > { %s416_s22 = scalar_lea.vmem %s608_s7, 32  ;;  %s515_s27 = smov [#allocation4]  }
  0x23   : > { %p417_p3 = scmp.ne.s32.totalorder %s608_s7, %s416_s22  ;;  %s421_s28 = sshll.u32 %s515_s27, 4  ;;  %s422_s28 = int_to_ptr.vmem [resolvable:$false] %s421_s28 }
  0x24   : > { %s423_s29 = scalar_lea.vmem %s422_s28, 64  ;;  %p424_p9 = scmp.lt.s32.totalorder %s608_s7, %s422_s28 }
  0x25   : > { %p419_p6 = pnand %p417_p3, %p403_p5  ;;  %p425_p4 = scmp.lt.s32.totalorder %s423_s29, %s416_s22 }
  0x27   : > { %p420_p11 = pneg %p419_p6  ;;  %p426_p10 = por %p425_p4, %p424_p9 }
  0x29   : > { %p427_p12 = pnand %p426_p10, %p420_p11 }
  0x2b   : > { %430 = shalt.err (!%p427_p12)
}
  0x2c   : > { %346 = dma.hbm_to_vmem [thread:$0]  (!%p612_p0), %s606_s5, 32, %s608_s7, %s140_s9  }
  0x2d   : > { %p722_p1 = scmp.lt.s32.totalorder %s513_s16, 3  ;;  %p723_p2 = scmp.ge.s32.totalorder %s513_s16, 1 }
  0x2f   : > { %p159_p5 = pnand %p723_p2, %p722_p1 }
  0x30   : > { %s648_s30 = sand.u32 (!%p159_p5), 1, %s497_s13  }
  0x31   : > { %162 = sbr.rel (%p159_p5) target bundleno = 83 (0x53), region = 28  ;;  %s330_s4 = sshll.u32 (!%p159_p5), %s648_s30, 1 }
  0x32   : > { %s165_s6 = scalar_lea.sflag (!%p159_p5), [#allocation5], %s648_s30  ;;  %s168_s10 = scalar_lea.vmem (!%p159_p5), [#allocation4], %s330_s4 }
  0x38   : > { %484 = dma.done.wait (%p584_p8), %s165_s6, 32  }
  0x39   : > { %486 = vsyncadd (%p584_p8), %s165_s6, 4294967264  ;;  %v200_v0 = vlaneseq  ;;  %s192_s5 = scalar_lea.vmem [#allocation7], %s330_s4  ;;  %s338_s8 = sshll.u32 %s505_s0, 5  ;;  %v197_v1 = vld [vmem:[%s168_s10] sm:$0x3] }
  0x3a   : > { %s222_s7 = sshll.u32 %s192_s5, 4  ;;  %v198_v2 = vld [vmem:[%s714_s2] sm:$0x3]  ;;  %s665_s23 = scalar_lea.hbm %s715_s3, %s338_s8  ;;  %s660_s7 = int_to_ptr.vmem [resolvable:$true] %s222_s7 }
  0x3b   : > { %vm202_vm0 = vcmp.lt.s32.totalorder %v200_v0, 256  ;;  %v199_v3 = vadd.f32 %v198_v2, %v197_v1  ;;  %s206_s20 = scalar_lea.sflag [#allocation6], %s648_s30  ;;  %s431_s0 = scalar_lea.vmem %s660_s7, 32 }
  0x3c   : > { %p432_p8 = scmp.ne.s32.totalorder %s660_s7, %s431_s0  ;;  %p724_p9 = scmp.ne.s32.totalorder %s719_s24, 0 }
  0x3d   : > { %204 = vst.msk [vmem:[%s192_s5] sm:$0x3] %vm202_vm0, %v199_v3  ;;  %s516_s21 = smov [#allocation7]  }
  0x3e   : > { %p433_p11 = pnand %p432_p8, %p724_p9  ;;  %s435_s22 = sshll.u32 %s516_s21, 4  ;;  %s436_s22 = int_to_ptr.vmem [resolvable:$false] %s435_s22 }
  0x3f   : > { %s437_s27 = scalar_lea.vmem %s436_s22, 64  ;;  %p438_p7 = scmp.lt.s32.totalorder %s660_s7, %s436_s22 }
  0x40   : > { %p434_p0 = pneg %p433_p11  ;;  %p439_p13 = scmp.lt.s32.totalorder %s437_s27, %s431_s0 }
  0x42   : > { %p440_p3 = por %p439_p13, %p438_p7 }
  0x44   : > { %p441_p6 = pnand %p440_p3, %p434_p0 }
  0x46   : > { %444 = shalt.err (!%p441_p6)
}
  0x47   : > { %s445_s28 = scalar_lea.hbm %s665_s23, 32  ;;  %s449_s4 = scalar_lea.hbm %s715_s3, 64 }
  0x48   : > { %p446_p4 = scmp.ne.s32.totalorder %s665_s23, %s445_s28  ;;  %p450_p1 = scmp.lt.u32.totalorder %s665_s23, %s715_s3 }
  0x49   : > { %p451_p2 = scmp.lt.u32.totalorder %s449_s4, %s445_s28  ;;  %p453_p8 = scmp.lt.u32.totalorder %s445_s28, %s665_s23 }
  0x4a   : > { %p447_p10 = pnand %p446_p4, %p724_p9 }
  0x4b   : > { %p452_p5 = por %p451_p2, %p450_p1 }
  0x4c   : > { %p448_p12 = pneg %p447_p10 }
  0x4d   : > { %p454_p11 = por %p453_p8, %p452_p5 }
  0x4f   : > { %p455_p0 = pnand %p454_p11, %p448_p12 }
  0x51   : > { %458 = shalt.err (!%p455_p0)
}
  0x52   : > { %341 = dma.vmem_to_hbm [thread:$0]  (%p724_p9), %s660_s7, 32, %s665_s23, %s206_s20  }
  0x53 PF: > { %s234_s5 = sand.u32 1, %s493_s12   ;;  %p725_p7 = scmp.ne.s32.totalorder %s720_s26, 0 }
  0x54   : > { %p726_p13 = scmp.ge.s32.totalorder %s513_s16, 2  ;;  %s235_s8 = scalar_lea.sflag [#allocation6], %s234_s5 }
  0x56   : > { %p348_p3 = pnand %p726_p13, %p725_p7 }
  0x58   : > { %488 = dma.done.wait (!%p348_p3), %s235_s8, 32  }
  0x59   : > { %490 = vsyncadd (!%p348_p3), %s235_s8, 4294967264  ;;  %s20_s16 = sadd.s32 1, %s513_s16   ;;  %s727_s12 = smov %s497_s13 }
  0x5a   : > { %p17_p6 = scmp.ge.s32.totalorder %s20_s16, 4   ;;  %s728_s13 = smov %s501_s14 }
  0x5b   : > { %s729_s14 = smov %s593_s25  ;;  %s730_s0 = smov %s509_s15 }
  0x5c   : > { %s731_s15 = smov %s733_s19  ;;  %19 = sbr.rel (!%p17_p6) target bundleno = 6 (0x6), region = 76 }
  0x63   :  { %240 = vsyncpa [#allocation5], 1 }
  0x64   :  { %242 = vsyncpa [#allocation5 + $0x1], 1 }
  0x65   :  { %243 = vsyncpa [#allocation6], 1 }
  0x66   :  { %245 = vsyncpa [#allocation6 + $0x1], 1 }

</bundles_post_ra>
